<compile_context>
chip_gen: v7x
topology: tpu7x:2x2x1
jax: 0.10.0
libtpu: 0.0.40
codegen_flags: <defaults>
</compile_context>

<pallas_src>
import jax
import jax.numpy as jnp
from jax.experimental import pallas as pl
from jax.experimental.pallas import tpu as pltpu

HIDDEN = 512
LANE = 128


def mlp_kernel(x_ref, w1_ref, b1_ref, w2_ref, b2_ref, w3_ref, b3_ref, o_ref):
    # Layer 1: in_features == 1, so x @ W1 is just a broadcast multiply.
    # VPU mul+add+max; avoids a wasted K=1 MXU push and its result-FIFO pop.
    x = x_ref[...]                                          # (TB, 1)   f32
    h1 = jnp.maximum(x * w1_ref[...] + b1_ref[...], 0.0)    # (TB, 512) f32

    # Layer 2: bf16 weights on the MXU, f32 accumulate; bias/ReLU in f32 (VPU).
    h2 = jnp.dot(h1.astype(w2_ref.dtype), w2_ref[...],
                 preferred_element_type=jnp.float32)
    h2 = jnp.maximum(h2 + b2_ref[...], 0.0)                 # (TB, 512) f32

    # Layer 3: lane-dense (128-wide zero-padded) output -> unmasked stores.
    o_ref[...] = (
        jnp.dot(h2.astype(w3_ref.dtype), w3_ref[...],
                preferred_element_type=jnp.float32)
        + b3_ref[...]
    )


def neural_network_forward(x, params, oup, *, block_batch=512):
    """x: (batch, 1) float32.  params: dict from init_params().  Returns (batch, oup)."""
    w1, b1 = params["w1"], params["b1"]          # (1, 512) f32, (1, 512) f32
    w2, b2 = params["w2"], params["b2"]          # (512, 512) bf16, (1, 512) f32
    w3, b3 = params["w3"], params["b3"]          # (512, OUT_PAD) bf16, (1, OUT_PAD) f32
    out_pad = w3.shape[1]

    batch = x.shape[0]
    # Pick a batch tile: up to 512 rows per step, sublane-aligned (multiple of 8).
    tb = min(block_batch, max(8, ((batch + 7) // 8) * 8))
    padded_batch = ((batch + tb - 1) // tb) * tb
    if padded_batch != batch:
        x = jnp.pad(x, ((0, padded_batch - batch), (0, 0)))
    grid = (pl.cdiv(padded_batch, tb),)

    # Weights/biases stay VMEM-resident across grid steps (constant block index).
    resident = lambda shape: pl.BlockSpec(shape, lambda i: (0, 0))

    flops = (2 * padded_batch * HIDDEN * (HIDDEN + out_pad)   # two MXU matmuls
             + 3 * padded_batch * HIDDEN)                     # layer-1 VPU mul/add/max
    bytes_accessed = (
        x.size * x.dtype.itemsize
        + sum(p.size * p.dtype.itemsize for p in (w1, b1, w2, b2, w3, b3))
        + padded_batch * out_pad * 4
    )

    out = pl.pallas_call(
        mlp_kernel,
        out_shape=jax.ShapeDtypeStruct((padded_batch, out_pad), jnp.float32),
        grid=grid,
        in_specs=[
            pl.BlockSpec((tb, 1), lambda i: (i, 0)),          # x tile
            resident((1, HIDDEN)),                            # w1
            resident((1, HIDDEN)),                            # b1
            resident((HIDDEN, HIDDEN)),                       # w2
            resident((1, HIDDEN)),                            # b2
            resident((HIDDEN, out_pad)),                      # w3 (padded)
            resident((1, out_pad)),                           # b3 (padded)
        ],
        out_specs=pl.BlockSpec((tb, out_pad), lambda i: (i, 0)),
        compiler_params=pltpu.CompilerParams(
            dimension_semantics=("parallel",)),
        cost_estimate=pl.CostEstimate(
            flops=flops, transcendentals=0, bytes_accessed=bytes_accessed),
    )(x, w1, b1, w2, b2, w3, b3)

    return out[:batch, :oup]


def init_params(key, oup_):
    """PyTorch-style init; weights stored pre-transposed (in, out).

    w2/w3 are kept in bfloat16 (MXU-native, halves weight DMA); biases and the
    tiny w1 stay f32.  w3/b3 are zero-padded to a lane-dense 128-wide output.
    """
    out_pad = ((oup_ + LANE - 1) // LANE) * LANE
    k1, k2, k3 = jax.random.split(key, 3)

    def lin(k, fan_in, fan_out):
        bound = 1.0 / jnp.sqrt(jnp.float32(fan_in))
        kw, kb = jax.random.split(k)
        w = jax.random.uniform(kw, (fan_in, fan_out), jnp.float32, -bound, bound)
        b = jax.random.uniform(kb, (1, fan_out), jnp.float32, -bound, bound)
        return w, b

    w1, b1 = lin(k1, 1, HIDDEN)
    w2, b2 = lin(k2, HIDDEN, HIDDEN)
    w3, b3 = lin(k3, HIDDEN, oup_)

    # Pad final layer to 128 output lanes (extra columns are zero; sliced away).
    w3p = jnp.zeros((HIDDEN, out_pad), jnp.float32).at[:, :oup_].set(w3)
    b3p = jnp.zeros((1, out_pad), jnp.float32).at[:, :oup_].set(b3)

    return {
        "w1": w1, "b1": b1,
        "w2": w2.astype(jnp.bfloat16), "b2": b2,
        "w3": w3p.astype(jnp.bfloat16), "b3": b3p,
    }


def reference_forward(x, params, oup):
    """Pure-JAX f32 reference using the (upcast) stored weights."""
    w1, b1 = params["w1"], params["b1"]
    w2, b2 = params["w2"].astype(jnp.float32), params["b2"]
    w3, b3 = params["w3"].astype(jnp.float32), params["b3"]
    h1 = jnp.maximum(x @ w1 + b1, 0.0)
    h2 = jnp.maximum(h1 @ w2 + b2, 0.0)
    return (h2 @ w3 + b3)[:, :oup]


if __name__ == "__main__":
    key = jax.random.PRNGKey(0)
    k_params, k_x = jax.random.split(key)

    batch = 8    # small test batch (sublane-friendly); kernel grids over larger batches
    oup_ = 8     # output dimension of the final Linear layer

    params = init_params(k_params, oup_)
    x = jax.random.uniform(k_x, (batch, 1), jnp.float32)

    out = neural_network_forward(x, params, oup_)
    out = jax.block_until_ready(out)

    ref = reference_forward(x, params, oup_)
    assert out.shape == (batch, oup_)
    # bf16 weights + bf16-cast activations at the MXU inputs -> ~1e-3 relative error.
    assert jnp.allclose(out, ref, atol=2e-2, rtol=2e-2), (
        float(jnp.max(jnp.abs(out - ref))))

    print("KERNEL_OK")
</pallas_src>

<mosaic_0001>
module attributes {stable_mosaic.version = 11 : i64} {
  func.func @mlp_kernel(%arg0: i32, %arg1: memref<8x1xf32, #tpu.memory_space<vmem>>, %arg2: memref<1x512xf32, #tpu.memory_space<vmem>>, %arg3: memref<1x512xf32, #tpu.memory_space<vmem>>, %arg4: memref<512x512xbf16, #tpu.memory_space<vmem>>, %arg5: memref<1x512xf32, #tpu.memory_space<vmem>>, %arg6: memref<512x128xbf16, #tpu.memory_space<vmem>>, %arg7: memref<1x128xf32, #tpu.memory_space<vmem>>, %arg8: memref<8x128xf32, #tpu.memory_space<vmem>>) attributes {dimension_semantics = [#tpu.dimension_semantics<parallel>], iteration_bounds = array<i64: 1>, scalar_prefetch = 0 : i64, scratch_operands = 0 : i64, tpu.core_type = #tpu.core_type<tc>, window_params = [{transform_indices = @transform_0, window_bounds = array<i64: 8, 1>}, {pipeline_mode = #tpu.pipeline_mode<synchronous>, transform_indices = @transform_1, window_bounds = array<i64: 1, 512>}, {pipeline_mode = #tpu.pipeline_mode<synchronous>, transform_indices = @transform_2, window_bounds = array<i64: 1, 512>}, {pipeline_mode = #tpu.pipeline_mode<synchronous>, transform_indices = @transform_3, window_bounds = array<i64: 512, 512>}, {pipeline_mode = #tpu.pipeline_mode<synchronous>, transform_indices = @transform_4, window_bounds = array<i64: 1, 512>}, {pipeline_mode = #tpu.pipeline_mode<synchronous>, transform_indices = @transform_5, window_bounds = array<i64: 512, 128>}, {pipeline_mode = #tpu.pipeline_mode<synchronous>, transform_indices = @transform_6, window_bounds = array<i64: 1, 128>}, {transform_indices = @transform_7, window_bounds = array<i64: 8, 128>}]} {
    %c0 = arith.constant 0 : index
    %c0_0 = arith.constant 0 : index
    %0 = vector.load %arg1[%c0, %c0_0] : memref<8x1xf32, #tpu.memory_space<vmem>>, vector<8x1xf32>
    %c0_1 = arith.constant 0 : index
    %c0_2 = arith.constant 0 : index
    %1 = vector.load %arg2[%c0_1, %c0_2] : memref<1x512xf32, #tpu.memory_space<vmem>>, vector<1x512xf32>
    %2 = vector.broadcast %0 : vector<8x1xf32> to vector<8x512xf32>
    %3 = vector.broadcast %1 : vector<1x512xf32> to vector<8x512xf32>
    %4 = arith.mulf %2, %3 : vector<8x512xf32>
    %c0_3 = arith.constant 0 : index
    %c0_4 = arith.constant 0 : index
    %5 = vector.load %arg3[%c0_3, %c0_4] : memref<1x512xf32, #tpu.memory_space<vmem>>, vector<1x512xf32>
    %6 = vector.broadcast %5 : vector<1x512xf32> to vector<8x512xf32>
    %7 = arith.addf %4, %6 : vector<8x512xf32>
    %cst = arith.constant 0.000000e+00 : f32
    %8 = vector.broadcast %cst : f32 to vector<8x512xf32>
    %9 = arith.maximumf %7, %8 : vector<8x512xf32>
    %10 = arith.truncf %9 : vector<8x512xf32> to vector<8x512xbf16>
    %c0_5 = arith.constant 0 : index
    %c0_6 = arith.constant 0 : index
    %11 = vector.load %arg4[%c0_5, %c0_6] : memref<512x512xbf16, #tpu.memory_space<vmem>>, vector<512x512xbf16>
    %cst_7 = arith.constant dense<0.000000e+00> : vector<8x512xf32>
    %12 = tpu.matmul %10, %11, %cst_7 {dimension_numbers = #tpu.dot_dimension_numbers<[1], [0], [0], [1], [0, 0, 1, 1], [], []>} : vector<8x512xbf16>, vector<512x512xbf16>, vector<8x512xf32> -> vector<8x512xf32>
    %c0_8 = arith.constant 0 : index
    %c0_9 = arith.constant 0 : index
    %13 = vector.load %arg5[%c0_8, %c0_9] : memref<1x512xf32, #tpu.memory_space<vmem>>, vector<1x512xf32>
    %14 = vector.broadcast %13 : vector<1x512xf32> to vector<8x512xf32>
    %15 = arith.addf %12, %14 : vector<8x512xf32>
    %cst_10 = arith.constant 0.000000e+00 : f32
    %16 = vector.broadcast %cst_10 : f32 to vector<8x512xf32>
    %17 = arith.maximumf %15, %16 : vector<8x512xf32>
    %18 = arith.truncf %17 : vector<8x512xf32> to vector<8x512xbf16>
    %c0_11 = arith.constant 0 : index
    %c0_12 = arith.constant 0 : index
    %19 = vector.load %arg6[%c0_11, %c0_12] : memref<512x128xbf16, #tpu.memory_space<vmem>>, vector<512x128xbf16>
    %cst_13 = arith.constant dense<0.000000e+00> : vector<8x128xf32>
    %20 = tpu.matmul %18, %19, %cst_13 {dimension_numbers = #tpu.dot_dimension_numbers<[1], [0], [0], [1], [0, 0, 1, 1], [], []>} : vector<8x512xbf16>, vector<512x128xbf16>, vector<8x128xf32> -> vector<8x128xf32>
    %c0_14 = arith.constant 0 : index
    %c0_15 = arith.constant 0 : index
    %21 = vector.load %arg7[%c0_14, %c0_15] : memref<1x128xf32, #tpu.memory_space<vmem>>, vector<1x128xf32>
    %22 = vector.broadcast %21 : vector<1x128xf32> to vector<8x128xf32>
    %23 = arith.addf %20, %22 : vector<8x128xf32>
    %c0_16 = arith.constant 0 : index
    %c0_17 = arith.constant 0 : index
    %24 = vector.load %arg8[%c0_16, %c0_17] : memref<8x128xf32, #tpu.memory_space<vmem>>, vector<8x128xf32>
    tpu.vector_store %arg8[%c0_16, %c0_17], %23 {strides = array<i32>} : memref<8x128xf32, #tpu.memory_space<vmem>>, vector<8x128xf32>,
    return
  }
  func.func @transform_0(%arg0: i32) -> (i32, i32) {
    %c0_i32 = arith.constant 0 : i32
    %c0_i32_0 = arith.constant 0 : i32
    return %arg0, %c0_i32 : i32, i32
  }
  func.func @transform_1(%arg0: i32) -> (i32, i32) {
    %c0_i32 = arith.constant 0 : i32
    %c0_i32_0 = arith.constant 0 : i32
    %c0_i32_1 = arith.constant 0 : i32
    return %c0_i32, %c0_i32_0 : i32, i32
  }
  func.func @transform_2(%arg0: i32) -> (i32, i32) {
    %c0_i32 = arith.constant 0 : i32
    %c0_i32_0 = arith.constant 0 : i32
    %c0_i32_1 = arith.constant 0 : i32
    return %c0_i32, %c0_i32_0 : i32, i32
  }
  func.func @transform_3(%arg0: i32) -> (i32, i32) {
    %c0_i32 = arith.constant 0 : i32
    %c0_i32_0 = arith.constant 0 : i32
    %c0_i32_1 = arith.constant 0 : i32
    return %c0_i32, %c0_i32_0 : i32, i32
  }
  func.func @transform_4(%arg0: i32) -> (i32, i32) {
    %c0_i32 = arith.constant 0 : i32
    %c0_i32_0 = arith.constant 0 : i32
    %c0_i32_1 = arith.constant 0 : i32
    return %c0_i32, %c0_i32_0 : i32, i32
  }
  func.func @transform_5(%arg0: i32) -> (i32, i32) {
    %c0_i32 = arith.constant 0 : i32
    %c0_i32_0 = arith.constant 0 : i32
    %c0_i32_1 = arith.constant 0 : i32
    return %c0_i32, %c0_i32_0 : i32, i32
  }
  func.func @transform_6(%arg0: i32) -> (i32, i32) {
    %c0_i32 = arith.constant 0 : i32
    %c0_i32_0 = arith.constant 0 : i32
    %c0_i32_1 = arith.constant 0 : i32
    return %c0_i32, %c0_i32_0 : i32, i32
  }
  func.func @transform_7(%arg0: i32) -> (i32, i32) {
    %c0_i32 = arith.constant 0 : i32
    %c0_i32_0 = arith.constant 0 : i32
    return %arg0, %c0_i32 : i32, i32
  }
}

</mosaic_0001>

<bundles_post_ra>
// kernel: tpu_custom_call.1
= control target key start
LH: loop header
LB: loop body
LE: loop exit
PB: predicated region body
PF: predicated region fallthrough
CT: control target
= control target key end

     0   :  { %12 = vsyncpa [#allocation3], 0  ;;  %s2088_s0 = inlined_call_operand.vmem [shape: f32[8,1], index: 0, kind: input, shape index: {}]   ;;  %s2089_s1 = inlined_call_operand.vmem [shape: f32[1,512], index: 1, kind: input, shape index: {}]   ;;  %s2090_s2 = inlined_call_operand.vmem [shape: f32[1,512], index: 2, kind: input, shape index: {}]   ;;  %s2091_s3 = inlined_call_operand.hbm [shape: bf16[512,512], index: 3, kind: input, shape index: {}]   ;;  %s2092_s4 = inlined_call_operand.vmem [shape: f32[1,512], index: 4, kind: input, shape index: {}]   ;;  %s2093_s5 = inlined_call_operand.hbm [shape: bf16[512,128], index: 5, kind: input, shape index: {}]   ;;  %s2094_s6 = inlined_call_operand.vmem [shape: f32[1,128], index: 6, kind: input, shape index: {}]   ;;  %s2095_s7 = inlined_call_operand.hbm [shape: f32[8,128], index: 7, kind: output, shape index: {}]  }
   0x1   :  { %13 = vsyncpa [#allocation6], 0 }
   0x2   :  { %14 = vsyncpa [#allocation4], 0  ;;  %s1966_s24 = smov [#allocation2]   ;;  %s1894_s28 = scalar_lea.hbm %s2091_s3, 16384 }
   0x3   :  { %s26_s25 = sshll.u32 %s1966_s24, 4  ;;  %p1895_p0 = scmp.ne.s32.totalorder %s2091_s3, %s1894_s28  ;;  %s27_s25 = int_to_ptr.vmem [resolvable:$true] %s26_s25 }
   0x4   :  { %p1898_p1 = scmp.lt.u32.totalorder %s1894_s28, %s2091_s3 }
   0x6   :  { %p1900_p2 = pnand %p1898_p1, %p1895_p0 }
   0x8   :  { %1903 = shalt.err (!%p1900_p2)
}
   0x9   :  { %s1904_s10 = scalar_lea.vmem %s27_s25, 16384  ;;  %p1909_p4 = scmp.lt.s32.totalorder %s27_s25, %s27_s25 }
   0xa   :  { %p1905_p3 = scmp.ne.s32.totalorder %s27_s25, %s1904_s10  ;;  %p1910_p5 = scmp.lt.s32.totalorder %s1904_s10, %s1904_s10 }
   0xc   :  { %p1911_p6 = por %p1910_p5, %p1909_p4 }
   0xe   :  { %p1912_p7 = pnand %p1911_p6, %p1905_p3 }
  0x10   :  { %1915 = shalt.err (!%p1912_p7)
}
  0x11   :  { %s1967_s11 = smov 256   ;;  %s1968_s12 = smov 16  }
  0x12   :  { %32 = dma.hbm_to_vmem [thread:$0]  %s2091_s3, 16384, %s27_s25, [#allocation3], %s1967_s11, %s1967_s11, %s1968_s12  }
  0x13   :  { %s1969_s15 = smov [#allocation5]   ;;  %s1916_s19 = scalar_lea.hbm %s2093_s5, 4096 }
  0x14   :  { %s40_s16 = sshll.u32 %s1969_s15, 4  ;;  %p1917_p8 = scmp.ne.s32.totalorder %s2093_s5, %s1916_s19  ;;  %s41_s16 = int_to_ptr.vmem [resolvable:$true] %s40_s16 }
  0x15   :  { %p1920_p9 = scmp.lt.u32.totalorder %s1916_s19, %s2093_s5 }
  0x17   :  { %p1922_p10 = pnand %p1920_p9, %p1917_p8 }
  0x19   :  { %1925 = shalt.err (!%p1922_p10)
}
  0x1a   :  { %s1926_s24 = scalar_lea.vmem %s41_s16, 4096  ;;  %p1931_p12 = scmp.lt.s32.totalorder %s41_s16, %s41_s16 }
  0x1b   :  { %p1927_p11 = scmp.ne.s32.totalorder %s41_s16, %s1926_s24  ;;  %p1932_p13 = scmp.lt.s32.totalorder %s1926_s24, %s1926_s24 }
  0x1d   :  { %p1933_p0 = por %p1932_p13, %p1931_p12 }
  0x1f   :  { %p1934_p1 = pnand %p1933_p0, %p1927_p11 }
  0x21   :  { %1937 = shalt.err (!%p1934_p1)
}
  0x22   :  { %s1970_s3 = smov 64   ;;  %s1971_s25 = smov 4  }
  0x23   :  { %46 = dma.hbm_to_vmem [thread:$0]  %s2093_s5, 4096, %s41_s16, [#allocation6], %s1970_s3, %s1970_s3, %s1971_s25  }
  0x24   :  { %1960 = dma.done.wait [#allocation3], 16384  }
  0x25   :  { %1961 = vsyncadd [#allocation3], 4294950912 }
  0x26   :  { %1962 = dma.done.wait [#allocation6], 4096  }
  0x27   :  { %1963 = vsyncadd [#allocation6], 4294963200  ;;  %v1972_v0 = vmov 0   ;;  %v56_v1 = vld [vmem:[%s2088_s0] sm:$0xff]  ;;  %v1672_v3 = vld [vmem:[#allocation2 + $0xc] ss:$16 sps:$4 sm:$0xff]  }
  0x28   :  { %1669 = vset.pattern.permute.xlu0 %v1972_v0  ;;  %v1670_v2 = vld [vmem:[#allocation2 + $0x4] ss:$16 sps:$4 sm:$0xff]   ;;  %v1674_v4 = vld [vmem:[#allocation2] ss:$16 sps:$4 sm:$0xff]   ;;  %v1675_v5 = vld [vmem:[#allocation2 + $0x8] ss:$16 sps:$4 sm:$0xff]   ;;  %994 = vmatprep.subr.bf16.mxu1 %v1672_v3 }
  0x29   :  { %60 = vperm.xlu0 %1669, %v56_v1   ;;  %912 = vmatprep.subr.bf16.mxu0 %v1670_v2  ;;  %v1676_v6 = vld [vmem:[#allocation2 + $0x24] ss:$16 sps:$4 sm:$0xff]   ;;  %v1678_v7 = vld [vmem:[#allocation2 + $0x2c] ss:$16 sps:$4 sm:$0xff]   ;;  %v1680_v8 = vld [vmem:[#allocation2 + $0x20] ss:$16 sps:$4 sm:$0xff]  }
  0x2a   :  { %913 = vmatpush1.bf16.msra.mxu0 %v1674_v4  ;;  %995 = vmatpush1.bf16.msra.mxu1 %v1675_v5  ;;  %v1681_v9 = vld [vmem:[#allocation2 + $0x28] ss:$16 sps:$4 sm:$0xff]   ;;  %v1682_v10 = vld [vmem:[#allocation2 + $0x44] ss:$16 sps:$4 sm:$0xff]   ;;  %v1684_v11 = vld [vmem:[#allocation2 + $0x4c] ss:$16 sps:$4 sm:$0xff]   ;;  %v64_v4 = vlaneseq }
  0x2b   :  { %914 = vmatprep.subr.bf16.mxu0 %v1676_v6  ;;  %996 = vmatprep.subr.bf16.mxu1 %v1678_v7  ;;  %v1686_v12 = vld [vmem:[#allocation2 + $0x40] ss:$16 sps:$4 sm:$0xff]   ;;  %v1687_v13 = vld [vmem:[#allocation2 + $0x48] ss:$16 sps:$4 sm:$0xff]   ;;  %v1688_v14 = vld [vmem:[#allocation2 + $0x64] ss:$16 sps:$4 sm:$0xff]  }
  0x2c   :  { %v1690_v15 = vld [vmem:[#allocation2 + $0x6c] ss:$16 sps:$4 sm:$0xff]   ;;  %v1692_v16 = vld [vmem:[#allocation2 + $0x60] ss:$16 sps:$4 sm:$0xff]   ;;  %v1693_v17 = vld [vmem:[#allocation2 + $0x68] ss:$16 sps:$4 sm:$0xff]  }
  0x2d   :  { %v1694_v18 = vld [vmem:[#allocation2 + $0x84] ss:$16 sps:$4 sm:$0xff]   ;;  %v1696_v19 = vld [vmem:[#allocation2 + $0x8c] ss:$16 sps:$4 sm:$0xff]   ;;  %v1698_v20 = vld [vmem:[#allocation2 + $0x80] ss:$16 sps:$4 sm:$0xff]  }
  0x2e   :  { %915 = vmatpush1.bf16.msra.mxu0 %v1680_v8  ;;  %997 = vmatpush1.bf16.msra.mxu1 %v1681_v9  ;;  %v1699_v21 = vld [vmem:[#allocation2 + $0x88] ss:$16 sps:$4 sm:$0xff]   ;;  %v1700_v22 = vld [vmem:[#allocation2 + $0xa4] ss:$16 sps:$4 sm:$0xff]   ;;  %v1702_v23 = vld [vmem:[#allocation2 + $0xac] ss:$16 sps:$4 sm:$0xff]  }
  0x2f   :  { %916 = vmatprep.subr.bf16.mxu0 %v1682_v10  ;;  %998 = vmatprep.subr.bf16.mxu1 %v1684_v11  ;;  %v1704_v24 = vld [vmem:[#allocation2 + $0xa0] ss:$16 sps:$4 sm:$0xff]   ;;  %v1705_v25 = vld [vmem:[#allocation2 + $0xa8] ss:$16 sps:$4 sm:$0xff]   ;;  %v1706_v26 = vld [vmem:[#allocation2 + $0xc4] ss:$16 sps:$4 sm:$0xff]  }
  0x30   :  { %v1708_v27 = vld [vmem:[#allocation2 + $0xcc] ss:$16 sps:$4 sm:$0xff]   ;;  %v1710_v28 = vld [vmem:[#allocation2 + $0xc0] ss:$16 sps:$4 sm:$0xff]   ;;  %v1711_v29 = vld [vmem:[#allocation2 + $0xc8] ss:$16 sps:$4 sm:$0xff]  }
  0x31   :  { %v1712_v30 = vld [vmem:[#allocation2 + $0xe4] ss:$16 sps:$4 sm:$0xff]   ;;  %v1714_v31 = vld [vmem:[#allocation2 + $0xec] ss:$16 sps:$4 sm:$0xff]   ;;  %v1716_v32 = vld [vmem:[#allocation2 + $0xe0] ss:$16 sps:$4 sm:$0xff]  }
  0x32   :  { %917 = vmatpush1.bf16.msra.mxu0 %v1686_v12  ;;  %999 = vmatpush1.bf16.msra.mxu1 %v1687_v13  ;;  %v1717_v33 = vld [vmem:[#allocation2 + $0xe8] ss:$16 sps:$4 sm:$0xff]   ;;  %v1718_v34 = vld [vmem:[#allocation2 + $0x104] ss:$16 sps:$4 sm:$0xff]   ;;  %v1720_v35 = vld [vmem:[#allocation2 + $0x10c] ss:$16 sps:$4 sm:$0xff]  }
  0x33   :  { %918 = vmatprep.subr.bf16.mxu0 %v1688_v14  ;;  %1000 = vmatprep.subr.bf16.mxu1 %v1690_v15  ;;  %v1722_v36 = vld [vmem:[#allocation2 + $0x100] ss:$16 sps:$4 sm:$0xff]   ;;  %v1723_v37 = vld [vmem:[#allocation2 + $0x108] ss:$16 sps:$4 sm:$0xff]   ;;  %v1724_v38 = vld [vmem:[#allocation2 + $0x124] ss:$16 sps:$4 sm:$0xff]  }
  0x34   :  { %v1726_v39 = vld [vmem:[#allocation2 + $0x12c] ss:$16 sps:$4 sm:$0xff]   ;;  %v1728_v40 = vld [vmem:[#allocation2 + $0x120] ss:$16 sps:$4 sm:$0xff]   ;;  %v1729_v41 = vld [vmem:[#allocation2 + $0x128] ss:$16 sps:$4 sm:$0xff]  }
  0x35   :  { %v1730_v42 = vld [vmem:[#allocation2 + $0x144] ss:$16 sps:$4 sm:$0xff]   ;;  %v1732_v43 = vld [vmem:[#allocation2 + $0x14c] ss:$16 sps:$4 sm:$0xff]   ;;  %v1734_v44 = vld [vmem:[#allocation2 + $0x140] ss:$16 sps:$4 sm:$0xff]  }
  0x36   :  { %919 = vmatpush1.bf16.msra.mxu0 %v1692_v16  ;;  %1001 = vmatpush1.bf16.msra.mxu1 %v1693_v17  ;;  %v1735_v45 = vld [vmem:[#allocation2 + $0x148] ss:$16 sps:$4 sm:$0xff]   ;;  %v1736_v46 = vld [vmem:[#allocation2 + $0x164] ss:$16 sps:$4 sm:$0xff]   ;;  %v1738_v47 = vld [vmem:[#allocation2 + $0x16c] ss:$16 sps:$4 sm:$0xff]  }
  0x37   :  { %920 = vmatprep.subr.bf16.mxu0 %v1694_v18  ;;  %1002 = vmatprep.subr.bf16.mxu1 %v1696_v19  ;;  %v1740_v48 = vld [vmem:[#allocation2 + $0x160] ss:$16 sps:$4 sm:$0xff]   ;;  %v1741_v49 = vld [vmem:[#allocation2 + $0x168] ss:$16 sps:$4 sm:$0xff]   ;;  %v1742_v50 = vld [vmem:[#allocation2 + $0x184] ss:$16 sps:$4 sm:$0xff]  }
  0x38   :  { %v1744_v51 = vld [vmem:[#allocation2 + $0x18c] ss:$16 sps:$4 sm:$0xff]   ;;  %v1746_v52 = vld [vmem:[#allocation2 + $0x180] ss:$16 sps:$4 sm:$0xff]   ;;  %v1747_v53 = vld [vmem:[#allocation2 + $0x188] ss:$16 sps:$4 sm:$0xff]  }
  0x39   :  { %v1748_v54 = vld [vmem:[#allocation2 + $0x1a4] ss:$16 sps:$4 sm:$0xff]   ;;  %v1750_v55 = vld [vmem:[#allocation2 + $0x1ac] ss:$16 sps:$4 sm:$0xff]   ;;  %v1752_v56 = vld [vmem:[#allocation2 + $0x1a0] ss:$16 sps:$4 sm:$0xff]  }
  0x3a   :  { %921 = vmatpush1.bf16.msra.mxu0 %v1698_v20  ;;  %1003 = vmatpush1.bf16.msra.mxu1 %v1699_v21  ;;  %v1753_v57 = vld [vmem:[#allocation2 + $0x1a8] ss:$16 sps:$4 sm:$0xff]   ;;  %v1754_v58 = vld [vmem:[#allocation2 + $0x1c4] ss:$16 sps:$4 sm:$0xff]   ;;  %v1756_v59 = vld [vmem:[#allocation2 + $0x1cc] ss:$16 sps:$4 sm:$0xff]  }
  0x3b   :  { %922 = vmatprep.subr.bf16.mxu0 %v1700_v22  ;;  %1004 = vmatprep.subr.bf16.mxu1 %v1702_v23  ;;  %v1758_v60 = vld [vmem:[#allocation2 + $0x1c0] ss:$16 sps:$4 sm:$0xff]   ;;  %v1759_v61 = vld [vmem:[#allocation2 + $0x1c8] ss:$16 sps:$4 sm:$0xff]   ;;  %v1760_v62 = vld [vmem:[#allocation2 + $0x1e4] ss:$16 sps:$4 sm:$0xff]  }
  0x3c   :  { %v1762_v63 = vld [vmem:[#allocation2 + $0x1ec] ss:$16 sps:$4 sm:$0xff]   ;;  %v1764_v0 = vld [vmem:[#allocation2 + $0x1e0] ss:$16 sps:$4 sm:$0xff]   ;;  %v1765_v1 = vld [vmem:[#allocation2 + $0x1e8] ss:$16 sps:$4 sm:$0xff]  }
  0x3d   :  { %v1768_v2 = vld [vmem:[#allocation2 + $0x204] ss:$16 sps:$4 sm:$0xff]   ;;  %v1771_v3 = vld [vmem:[#allocation2 + $0x20c] ss:$16 sps:$4 sm:$0xff]   ;;  %v65_v5 = vshrl.u32 %v64_v4, 7  ;;  %s1973_s10 = smov [#allocation7]  }
  0x3e   :  { %923 = vmatpush1.bf16.msra.mxu0 %v1704_v24  ;;  %1005 = vmatpush1.bf16.msra.mxu1 %v1705_v25  ;;  %v57_v10 = vld [vmem:[%s2089_s1] sm:$0xf]  ;;  %v1817_v4 = vld [vmem:[#allocation2 + $0x308] ss:$16 sps:$4 sm:$0xff]   ;;  %s1434_s11 = sshll.u32 %s1973_s10, 4  ;;  %s1435_s11 = int_to_ptr.vmem [resolvable:$true] %s1434_s11 }
  0x3f   :  { %924 = vmatprep.subr.bf16.mxu0 %v1706_v26  ;;  %1006 = vmatprep.subr.bf16.mxu1 %v1708_v27  ;;  %v2041_v6 = vsub.s32 0, %v65_v5  ;;  %v2043_v7 = vsub.s32 1, %v65_v5  ;;  %v2045_v8 = vsub.s32 2, %v65_v5  ;;  %v2047_v9 = vsub.s32 3, %v65_v5  ;;  %v88_v11 = vld [vmem:[%s2090_s2] sm:$0xf]  ;;  %p1943_p3 = scmp.lt.s32.totalorder %s1435_s11, %s1435_s11 }
  0x40   :  { %v1822_v5 = vld [vmem:[#allocation2 + $0x324] ss:$16 sps:$4 sm:$0xff]   ;;  %s1938_s12 = scalar_lea.vmem %s1435_s11, 128 }
  0x41   :  { %v67_v12 = vrot.slane %v57_v10, %v2041_v6  ;;  %v71_v13 = vrot.slane %v57_v10, %v2043_v7  ;;  %v75_v14 = vrot.slane %v57_v10, %v2045_v8  ;;  %v79_v15 = vrot.slane %v57_v10, %v2047_v9  ;;  %v1825_v10 = vld [vmem:[#allocation2 + $0x32c] ss:$16 sps:$4 sm:$0xff]   ;;  %p1939_p2 = scmp.ne.s32.totalorder %s1435_s11, %s1938_s12  ;;  %p1944_p4 = scmp.lt.s32.totalorder %s1938_s12, %s1938_s12 }
  0x42   :  { %925 = vmatpush1.bf16.msra.mxu0 %v1710_v28  ;;  %1007 = vmatpush1.bf16.msra.mxu1 %v1711_v29  ;;  %v101_v16 = vrot.slane %v88_v11, %v2045_v8  ;;  %v97_v17 = vrot.slane %v88_v11, %v2043_v7  ;;  %v93_v18 = vrot.slane %v88_v11, %v2041_v6 }
  0x43   :  { %926 = vmatprep.subr.bf16.mxu0 %v1712_v30  ;;  %1008 = vmatprep.subr.bf16.mxu1 %v1714_v31  ;;  %v105_v19 = vrot.slane %v88_v11, %v2047_v9  ;;  %v1820_v11 = vld [vmem:[#allocation2 + $0x320] ss:$16 sps:$4 sm:$0xff]   ;;  %p1945_p5 = por %p1944_p4, %p1943_p3 }
  0x45   :  { %p1946_p6 = pnand %p1945_p5, %p1939_p2 }
  0x46   :  { %927 = vmatpush1.bf16.msra.mxu0 %v1716_v32  ;;  %1009 = vmatpush1.bf16.msra.mxu1 %v1717_v33  ;;  %v1766_v33 = vld [vmem:[#allocation2 + $0x200] ss:$16 sps:$4 sm:$0xff]  }
  0x47   :  { %928 = vmatprep.subr.bf16.mxu0 %v1718_v34  ;;  %1010 = vmatprep.subr.bf16.mxu1 %v1720_v35  ;;  %v1769_v34 = vld [vmem:[#allocation2 + $0x208] ss:$16 sps:$4 sm:$0xff]  }
  0x4a   :  { %929 = vmatpush1.bf16.msra.mxu0 %v1722_v36  ;;  %1011 = vmatpush1.bf16.msra.mxu1 %v1723_v37  ;;  %v1774_v36 = vld [vmem:[#allocation2 + $0x224] ss:$16 sps:$4 sm:$0xff]   ;;  %v1777_v37 = vld [vmem:[#allocation2 + $0x22c] ss:$16 sps:$4 sm:$0xff]  }
  0x4b   :  { %930 = vmatprep.subr.bf16.mxu0 %v1724_v38  ;;  %1012 = vmatprep.subr.bf16.mxu1 %v1726_v39  ;;  %v1772_v39 = vld [vmem:[#allocation2 + $0x220] ss:$16 sps:$4 sm:$0xff]  }
  0x4e   :  { %931 = vmatpush1.bf16.msra.mxu0 %v1728_v40  ;;  %1013 = vmatpush1.bf16.msra.mxu1 %v1729_v41  ;;  %v1775_v40 = vld [vmem:[#allocation2 + $0x228] ss:$16 sps:$4 sm:$0xff]   ;;  %v1780_v41 = vld [vmem:[#allocation2 + $0x244] ss:$16 sps:$4 sm:$0xff]  }
  0x4f   :  { %932 = vmatprep.subr.bf16.mxu0 %v1730_v42  ;;  %1014 = vmatprep.subr.bf16.mxu1 %v1732_v43  ;;  %v1783_v42 = vld [vmem:[#allocation2 + $0x24c] ss:$16 sps:$4 sm:$0xff]   ;;  %v1778_v43 = vld [vmem:[#allocation2 + $0x240] ss:$16 sps:$4 sm:$0xff]  }
  0x52   :  { %933 = vmatpush1.bf16.msra.mxu0 %v1734_v44  ;;  %1015 = vmatpush1.bf16.msra.mxu1 %v1735_v45  ;;  %v1781_v44 = vld [vmem:[#allocation2 + $0x248] ss:$16 sps:$4 sm:$0xff]   ;;  %v1786_v45 = vld [vmem:[#allocation2 + $0x264] ss:$16 sps:$4 sm:$0xff]  }
  0x53   :  { %934 = vmatprep.subr.bf16.mxu0 %v1736_v46  ;;  %1016 = vmatprep.subr.bf16.mxu1 %v1738_v47  ;;  %v1789_v46 = vld [vmem:[#allocation2 + $0x26c] ss:$16 sps:$4 sm:$0xff]   ;;  %v1784_v47 = vld [vmem:[#allocation2 + $0x260] ss:$16 sps:$4 sm:$0xff]  }
  0x56   :  { %935 = vmatpush1.bf16.msra.mxu0 %v1740_v48  ;;  %1017 = vmatpush1.bf16.msra.mxu1 %v1741_v49  ;;  %v1787_v48 = vld [vmem:[#allocation2 + $0x268] ss:$16 sps:$4 sm:$0xff]   ;;  %v1792_v49 = vld [vmem:[#allocation2 + $0x284] ss:$16 sps:$4 sm:$0xff]  }
  0x57   :  { %936 = vmatprep.subr.bf16.mxu0 %v1742_v50  ;;  %1018 = vmatprep.subr.bf16.mxu1 %v1744_v51  ;;  %v1795_v50 = vld [vmem:[#allocation2 + $0x28c] ss:$16 sps:$4 sm:$0xff]   ;;  %v1790_v51 = vld [vmem:[#allocation2 + $0x280] ss:$16 sps:$4 sm:$0xff]  }
  0x5a   :  { %937 = vmatpush1.bf16.msra.mxu0 %v1746_v52  ;;  %1019 = vmatpush1.bf16.msra.mxu1 %v1747_v53  ;;  %v1793_v52 = vld [vmem:[#allocation2 + $0x288] ss:$16 sps:$4 sm:$0xff]   ;;  %v1798_v53 = vld [vmem:[#allocation2 + $0x2a4] ss:$16 sps:$4 sm:$0xff]  }
  0x5b   :  { %938 = vmatprep.subr.bf16.mxu0 %v1748_v54  ;;  %1020 = vmatprep.subr.bf16.mxu1 %v1750_v55  ;;  %v1801_v54 = vld [vmem:[#allocation2 + $0x2ac] ss:$16 sps:$4 sm:$0xff]   ;;  %v1796_v55 = vld [vmem:[#allocation2 + $0x2a0] ss:$16 sps:$4 sm:$0xff]  }
  0x5e   :  { %939 = vmatpush1.bf16.msra.mxu0 %v1752_v56  ;;  %1021 = vmatpush1.bf16.msra.mxu1 %v1753_v57  ;;  %v1799_v56 = vld [vmem:[#allocation2 + $0x2a8] ss:$16 sps:$4 sm:$0xff]   ;;  %v1804_v57 = vld [vmem:[#allocation2 + $0x2c4] ss:$16 sps:$4 sm:$0xff]  }
  0x5f   :  { %940 = vmatprep.subr.bf16.mxu0 %v1754_v58  ;;  %1022 = vmatprep.subr.bf16.mxu1 %v1756_v59  ;;  %v1807_v58 = vld [vmem:[#allocation2 + $0x2cc] ss:$16 sps:$4 sm:$0xff]   ;;  %v1802_v59 = vld [vmem:[#allocation2 + $0x2c0] ss:$16 sps:$4 sm:$0xff]  }
  0x62   :  { %941 = vmatpush1.bf16.msra.mxu0 %v1758_v60  ;;  %1023 = vmatpush1.bf16.msra.mxu1 %v1759_v61  ;;  %v1805_v60 = vld [vmem:[#allocation2 + $0x2c8] ss:$16 sps:$4 sm:$0xff]   ;;  %v1810_v61 = vld [vmem:[#allocation2 + $0x2e4] ss:$16 sps:$4 sm:$0xff]  }
  0x63   :  { %942 = vmatprep.subr.bf16.mxu0 %v1760_v62  ;;  %1024 = vmatprep.subr.bf16.mxu1 %v1762_v63  ;;  %v1813_v62 = vld [vmem:[#allocation2 + $0x2ec] ss:$16 sps:$4 sm:$0xff]   ;;  %v1808_v63 = vld [vmem:[#allocation2 + $0x2e0] ss:$16 sps:$4 sm:$0xff]  }
  0x66   :  { %943 = vmatpush1.bf16.msra.mxu0 %v1764_v0  ;;  %1025 = vmatpush1.bf16.msra.mxu1 %v1765_v1  ;;  %v1811_v0 = vld [vmem:[#allocation2 + $0x2e8] ss:$16 sps:$4 sm:$0xff]   ;;  %v1816_v1 = vld [vmem:[#allocation2 + $0x304] ss:$16 sps:$4 sm:$0xff]  }
  0x67   :  { %953 = vmatprep.subr.bf16.mxu0 %v1768_v2  ;;  %1035 = vmatprep.subr.bf16.mxu1 %v1771_v3  ;;  %v1819_v2 = vld [vmem:[#allocation2 + $0x30c] ss:$16 sps:$4 sm:$0xff]   ;;  %v1814_v3 = vld [vmem:[#allocation2 + $0x300] ss:$16 sps:$4 sm:$0xff]  }
  0xa8   :  { %v61_v20 = vpop.permute.xlu0 %60 }
  0xa9   :  { %v84_v21 = vmul.f32 %v67_v12, %v61_v20  ;;  %v85_v22 = vmul.f32 %v71_v13, %v61_v20  ;;  %v86_v23 = vmul.f32 %v75_v14, %v61_v20  ;;  %v87_v24 = vmul.f32 %v79_v15, %v61_v20  ;;  %v1823_v12 = vld [vmem:[#allocation2 + $0x328] ss:$16 sps:$4 sm:$0xff]   ;;  %v1828_v13 = vld [vmem:[#allocation2 + $0x344] ss:$16 sps:$4 sm:$0xff]   ;;  %v1831_v14 = vld [vmem:[#allocation2 + $0x34c] ss:$16 sps:$4 sm:$0xff]  }
  0xaa   :  { %v1826_v15 = vld [vmem:[#allocation2 + $0x340] ss:$16 sps:$4 sm:$0xff]   ;;  %v1835_v20 = vld [vmem:[#allocation2 + $0x368] ss:$16 sps:$4 sm:$0xff]  }
  0xab   :  { %v2063_v25 = vadd.f32 %v101_v16, %v86_v23  ;;  %v111_v26 = vadd.f32 %v97_v17, %v85_v22  ;;  %v110_v27 = vadd.f32 %v93_v18, %v84_v21  ;;  %v113_v28 = vadd.f32 %v105_v19, %v87_v24  ;;  %v1829_v16 = vld [vmem:[#allocation2 + $0x348] ss:$16 sps:$4 sm:$0xff]   ;;  %v1834_v17 = vld [vmem:[#allocation2 + $0x364] ss:$16 sps:$4 sm:$0xff]   ;;  %v1837_v18 = vld [vmem:[#allocation2 + $0x36c] ss:$16 sps:$4 sm:$0xff]  }
  0xac   :  { %v1832_v19 = vld [vmem:[#allocation2 + $0x360] ss:$16 sps:$4 sm:$0xff]   ;;  %v1840_v21 = vld [vmem:[#allocation2 + $0x384] ss:$16 sps:$4 sm:$0xff]   ;;  %v1843_v22 = vld [vmem:[#allocation2 + $0x38c] ss:$16 sps:$4 sm:$0xff]  }
  0xad   :  { %v115_v29 = vmax.f32 %v111_v26, 0.0  ;;  %v114_v30 = vmax.f32 %v110_v27, 0.0  ;;  %v117_v31 = vmax.f32 %v113_v28, 0.0  ;;  %v1838_v23 = vld [vmem:[#allocation2 + $0x380] ss:$16 sps:$4 sm:$0xff]  }
  0xae   :  { %v1841_v24 = vld [vmem:[#allocation2 + $0x388] ss:$16 sps:$4 sm:$0xff]   ;;  %v1846_v26 = vld [vmem:[#allocation2 + $0x3a4] ss:$16 sps:$4 sm:$0xff]   ;;  %v1849_v27 = vld [vmem:[#allocation2 + $0x3ac] ss:$16 sps:$4 sm:$0xff]  }
  0xaf   :  { %v119_v32 = vpack.c.bf16 %v115_v29, %v115_v29  ;;  %v118_v35 = vpack.c.bf16 %v114_v30, %v114_v30  ;;  %v121_v38 = vpack.c.bf16 %v117_v31, %v117_v31  ;;  %v1844_v28 = vld [vmem:[#allocation2 + $0x3a0] ss:$16 sps:$4 sm:$0xff]   ;;  %v1847_v29 = vld [vmem:[#allocation2 + $0x3a8] ss:$16 sps:$4 sm:$0xff]   ;;  %v1852_v30 = vld [vmem:[#allocation2 + $0x3c4] ss:$16 sps:$4 sm:$0xff]  }
  0xb0   :  { %v1855_v31 = vld [vmem:[#allocation2 + $0x3cc] ss:$16 sps:$4 sm:$0xff]  }
  0xb1   :  { %944 = vmatprep.mubr.bf16.mxu0 %v119_v32  ;;  %1026 = vmatprep.mubr.bf16.mxu1 %v119_v32  ;;  %v1850_v32 = vld [vmem:[#allocation2 + $0x3c0] ss:$16 sps:$4 sm:$0xff]  }
  0xb2   :  { %945 = vmatmul.mubr.bf16.vlgmr.msra.gmra.mrb[0].mxu0 %v118_v35  ;;  %1027 = vmatmul.mubr.bf16.vlgmr.msra.gmra.mrb[0].mxu1 %v118_v35  ;;  %v1861_v35 = vld [vmem:[#allocation2 + $0x3ec] ss:$16 sps:$4 sm:$0xff]  }
  0xb3   :  { %954 = vmatpush1.bf16.msra.mxu0 %v1766_v33  ;;  %1036 = vmatpush1.bf16.msra.mxu1 %v1769_v34  ;;  %v1853_v33 = vld [vmem:[#allocation2 + $0x3c8] ss:$16 sps:$4 sm:$0xff]   ;;  %v1858_v34 = vld [vmem:[#allocation2 + $0x3e4] ss:$16 sps:$4 sm:$0xff]  }
  0xb4   :  { %985 = vmatprep.mubr.bf16.mxu0 %v121_v38  ;;  %1067 = vmatprep.mubr.bf16.mxu1 %v121_v38  ;;  %v116_v38 = vmax.f32 %v2063_v25, 0.0  ;;  %v1870_v25 = vld [vmem:[#allocation5 + $0x50] sm:$0xff]  }
  0xb5   :  { %955 = vmatprep.subr.bf16.mxu0 %v1774_v36  ;;  %1037 = vmatprep.subr.bf16.mxu1 %v1777_v37  ;;  %v1856_v36 = vld [vmem:[#allocation2 + $0x3e0] ss:$16 sps:$4 sm:$0xff]   ;;  %v1859_v37 = vld [vmem:[#allocation2 + $0x3e8] ss:$16 sps:$4 sm:$0xff]  }
  0xb7   :  { %956 = vmatpush1.bf16.msra.mxu0 %v1772_v39  ;;  %1038 = vmatpush1.bf16.msra.mxu1 %v1775_v40  ;;  %v1862_v39 = vld [vmem:[#allocation5 + $0x40] sm:$0xff]  }
  0xb8   :  { %957 = vmatprep.subr.bf16.mxu0 %v1780_v41  ;;  %1039 = vmatprep.subr.bf16.mxu1 %v1783_v42  ;;  %v1863_v40 = vld [vmem:[#allocation5 + $0xc0] sm:$0xff]  }
  0xb9   :  { %v1864_v41 = vld [vmem:[#allocation5] sm:$0xff]  }
  0xba   :  { %v1865_v42 = vld [vmem:[#allocation5 + $0x80] sm:$0xff]  }
  0xbb   :  { %958 = vmatpush1.bf16.msra.mxu0 %v1778_v43  ;;  %1040 = vmatpush1.bf16.msra.mxu1 %v1781_v44  ;;  %v120_v43 = vpack.c.bf16 %v116_v38, %v116_v38  ;;  %v1866_v44 = vld [vmem:[#allocation5 + $0x48] sm:$0xff]  }
  0xbc   :  { %959 = vmatprep.subr.bf16.mxu0 %v1786_v45  ;;  %1041 = vmatprep.subr.bf16.mxu1 %v1789_v46  ;;  %v1867_v45 = vld [vmem:[#allocation5 + $0xc8] sm:$0xff]  }
  0xbd   :  { %v1868_v46 = vld [vmem:[#allocation5 + $0x8] sm:$0xff]  }
  0xbf   :  { %960 = vmatpush1.bf16.msra.mxu0 %v1784_v47  ;;  %1042 = vmatpush1.bf16.msra.mxu1 %v1787_v48  ;;  %v1869_v47 = vld [vmem:[#allocation5 + $0x88] sm:$0xff]   ;;  %v1871_v48 = vld [vmem:[#allocation5 + $0xd0] sm:$0xff]  }
  0xc0   :  { %961 = vmatprep.subr.bf16.mxu0 %v1792_v49  ;;  %1043 = vmatprep.subr.bf16.mxu1 %v1795_v50  ;;  %v1872_v49 = vld [vmem:[#allocation5 + $0x10] sm:$0xff]  }
  0xc1   :  { %v1873_v50 = vld [vmem:[#allocation5 + $0x90] sm:$0xff]  }
  0xc3   :  { %962 = vmatpush1.bf16.msra.mxu0 %v1790_v51  ;;  %1044 = vmatpush1.bf16.msra.mxu1 %v1793_v52  ;;  %v1874_v51 = vld [vmem:[#allocation5 + $0x58] sm:$0xff]  }
  0xc4   :  { %963 = vmatprep.subr.bf16.mxu0 %v1798_v53  ;;  %1045 = vmatprep.subr.bf16.mxu1 %v1801_v54  ;;  %v1875_v52 = vld [vmem:[#allocation5 + $0xd8] sm:$0xff]  }
  0xc5   :  { %v1876_v53 = vld [vmem:[#allocation5 + $0x18] sm:$0xff]  }
  0xc6   :  { %v1877_v54 = vld [vmem:[#allocation5 + $0x98] sm:$0xff]  }
  0xc7   :  { %964 = vmatpush1.bf16.msra.mxu0 %v1796_v55  ;;  %1046 = vmatpush1.bf16.msra.mxu1 %v1799_v56  ;;  %v1878_v55 = vld [vmem:[#allocation5 + $0x60] sm:$0xff]  }
  0xc8   :  { %965 = vmatprep.subr.bf16.mxu0 %v1804_v57  ;;  %1047 = vmatprep.subr.bf16.mxu1 %v1807_v58  ;;  %v1879_v56 = vld [vmem:[#allocation5 + $0xe0] sm:$0xff]  }
  0xc9   :  { %v1880_v57 = vld [vmem:[#allocation5 + $0x20] sm:$0xff]  }
  0xca   :  { %v1881_v58 = vld [vmem:[#allocation5 + $0xa0] sm:$0xff]  }
  0xcb   :  { %966 = vmatpush1.bf16.msra.mxu0 %v1802_v59  ;;  %1048 = vmatpush1.bf16.msra.mxu1 %v1805_v60  ;;  %v1882_v59 = vld [vmem:[#allocation5 + $0x68] sm:$0xff]  }
  0xcc   :  { %967 = vmatprep.subr.bf16.mxu0 %v1810_v61  ;;  %1049 = vmatprep.subr.bf16.mxu1 %v1813_v62  ;;  %v1883_v60 = vld [vmem:[#allocation5 + $0xe8] sm:$0xff]  }
  0xcd   :  { %v1884_v61 = vld [vmem:[#allocation5 + $0x28] sm:$0xff]  }
  0xce   :  { %v1885_v62 = vld [vmem:[#allocation5 + $0xa8] sm:$0xff]  }
  0xcf   :  { %968 = vmatpush1.bf16.msra.mxu0 %v1808_v63  ;;  %1050 = vmatpush1.bf16.msra.mxu1 %v1811_v0  ;;  %v1886_v63 = vld [vmem:[#allocation5 + $0x70] sm:$0xff]  }
  0xd0   :  { %969 = vmatprep.subr.bf16.mxu0 %v1816_v1  ;;  %1051 = vmatprep.subr.bf16.mxu1 %v1819_v2  ;;  %v1887_v0 = vld [vmem:[#allocation5 + $0xf0] sm:$0xff]  }
  0xd1   :  { %v1888_v1 = vld [vmem:[#allocation5 + $0x30] sm:$0xff]  }
  0xd2   :  { %v1889_v2 = vld [vmem:[#allocation5 + $0xb0] sm:$0xff]  }
  0xd3   :  { %970 = vmatpush1.bf16.msra.mxu0 %v1814_v3  ;;  %1052 = vmatpush1.bf16.msra.mxu1 %v1817_v4  ;;  %v1890_v3 = vld [vmem:[#allocation5 + $0x78] sm:$0xff]  }
  0xd4   :  { %971 = vmatprep.subr.bf16.mxu0 %v1822_v5  ;;  %1053 = vmatprep.subr.bf16.mxu1 %v1825_v10  ;;  %v1891_v4 = vld [vmem:[#allocation5 + $0xf8] sm:$0xff]  }
  0xd5   :  { %v1892_v5 = vld [vmem:[#allocation5 + $0x38] sm:$0xff]  }
  0xd6   :  { %v1893_v10 = vld [vmem:[#allocation5 + $0xb8] sm:$0xff]  }
  0xd7   :  { %972 = vmatpush1.bf16.msra.mxu0 %v1820_v11  ;;  %1054 = vmatpush1.bf16.msra.mxu1 %v1823_v12  ;;  %v250_v11 = vld [vmem:[%s2092_s4] sm:$0xf] }
  0xd8   :  { %973 = vmatprep.subr.bf16.mxu0 %v1828_v13  ;;  %1055 = vmatprep.subr.bf16.mxu1 %v1831_v14  ;;  %v255_v12 = vrot.slane %v250_v11, %v2041_v6  ;;  %v263_v13 = vrot.slane %v250_v11, %v2045_v8  ;;  %v259_v14 = vrot.slane %v250_v11, %v2043_v7 }
  0xdb   :  { %974 = vmatpush1.bf16.msra.mxu0 %v1826_v15  ;;  %1056 = vmatpush1.bf16.msra.mxu1 %v1829_v16  ;;  %v267_v15 = vrot.slane %v250_v11, %v2047_v9 }
  0xdc   :  { %975 = vmatprep.subr.bf16.mxu0 %v1834_v17  ;;  %1057 = vmatprep.subr.bf16.mxu1 %v1837_v18 }
  0xdf   :  { %976 = vmatpush1.bf16.msra.mxu0 %v1832_v19  ;;  %1058 = vmatpush1.bf16.msra.mxu1 %v1835_v20 }
  0xe0   :  { %977 = vmatprep.subr.bf16.mxu0 %v1840_v21  ;;  %1059 = vmatprep.subr.bf16.mxu1 %v1843_v22 }
  0xe3   :  { %978 = vmatpush1.bf16.msra.mxu0 %v1838_v23  ;;  %1060 = vmatpush1.bf16.msra.mxu1 %v1841_v24 }
  0xe4   :  { %979 = vmatprep.subr.bf16.mxu0 %v1846_v26  ;;  %1061 = vmatprep.subr.bf16.mxu1 %v1849_v27 }
  0xe7   :  { %980 = vmatpush1.bf16.msra.mxu0 %v1844_v28  ;;  %1062 = vmatpush1.bf16.msra.mxu1 %v1847_v29 }
  0xe8   :  { %981 = vmatprep.subr.bf16.mxu0 %v1852_v30  ;;  %1063 = vmatprep.subr.bf16.mxu1 %v1855_v31 }
  0xeb   :  { %982 = vmatpush1.bf16.msra.mxu0 %v1850_v32  ;;  %1064 = vmatpush1.bf16.msra.mxu1 %v1853_v33 }
  0xec   :  { %983 = vmatprep.subr.bf16.mxu0 %v1858_v34  ;;  %1065 = vmatprep.subr.bf16.mxu1 %v1861_v35  ;;  %v1572_v35 = vld [vmem:[%s2094_s6] ss:$0 sm:$0xff] }
  0xef   :  { %984 = vmatpush1.bf16.msra.mxu0 %v1856_v36  ;;  %1066 = vmatpush1.bf16.msra.mxu1 %v1859_v37 }
  0xf0   :  { %1605 = vmatprep.subr.bf16.mxu0 %v1862_v39  ;;  %1627 = vmatprep.subr.bf16.mxu1 %v1863_v40 }
  0xf2   :  { %986 = vmatmul.mubr.bf16.vlgmr.msra.gmra.mrb[0].mxu0 %v120_v43  ;;  %1068 = vmatmul.mubr.bf16.vlgmr.msra.gmra.mrb[0].mxu1 %v120_v43 }
  0xf3   :  { %1606 = vmatpush3.bf16.msra.mxu0 %v1864_v41  ;;  %1628 = vmatpush3.bf16.msra.mxu1 %v1865_v42 }
  0xf4   :  { %1607 = vmatprep.subr.bf16.mxu0 %v1866_v44  ;;  %1629 = vmatprep.subr.bf16.mxu1 %v1867_v45 }
  0xf7   :  { %1608 = vmatpush3.bf16.msra.mxu0 %v1868_v46  ;;  %1630 = vmatpush3.bf16.msra.mxu1 %v1869_v47 }
  0xf8   :  { %1609 = vmatprep.subr.bf16.mxu0 %v1870_v25  ;;  %1631 = vmatprep.subr.bf16.mxu1 %v1871_v48 }
  0xfb   :  { %1610 = vmatpush3.bf16.msra.mxu0 %v1872_v49  ;;  %1632 = vmatpush3.bf16.msra.mxu1 %v1873_v50 }
  0xfc   :  { %1611 = vmatprep.subr.bf16.mxu0 %v1874_v51  ;;  %1633 = vmatprep.subr.bf16.mxu1 %v1875_v52 }
  0xff   :  { %1612 = vmatpush3.bf16.msra.mxu0 %v1876_v53  ;;  %1634 = vmatpush3.bf16.msra.mxu1 %v1877_v54 }
 0x100   :  { %1613 = vmatprep.subr.bf16.mxu0 %v1878_v55  ;;  %1635 = vmatprep.subr.bf16.mxu1 %v1879_v56 }
 0x103   :  { %1614 = vmatpush3.bf16.msra.mxu0 %v1880_v57  ;;  %1636 = vmatpush3.bf16.msra.mxu1 %v1881_v58 }
 0x104   :  { %1615 = vmatprep.subr.bf16.mxu0 %v1882_v59  ;;  %1637 = vmatprep.subr.bf16.mxu1 %v1883_v60 }
 0x107   :  { %1616 = vmatpush3.bf16.msra.mxu0 %v1884_v61  ;;  %1638 = vmatpush3.bf16.msra.mxu1 %v1885_v62 }
 0x108   :  { %1617 = vmatprep.subr.bf16.mxu0 %v1886_v63  ;;  %1639 = vmatprep.subr.bf16.mxu1 %v1887_v0 }
 0x10b   :  { %1618 = vmatpush3.bf16.msra.mxu0 %v1888_v1  ;;  %1640 = vmatpush3.bf16.msra.mxu1 %v1889_v2 }
 0x10c   :  { %1619 = vmatprep.subr.bf16.mxu0 %v1890_v3  ;;  %1641 = vmatprep.subr.bf16.mxu1 %v1891_v4 }
 0x10f   :  { %1620 = vmatpush3.bf16.msra.mxu0 %v1892_v5  ;;  %1642 = vmatpush3.bf16.msra.mxu1 %v1893_v10 }
 0x1c5   :  { %v987_v16 = vpop.f32.mrb[0].mxu0  ;;  %v1069_v17 = vpop.f32.mrb[0].mxu1 }
 0x1c6   :  { %v1649_v18 = vadd.f32 %v987_v16, %v255_v12  ;;  %v1651_v19 = vadd.f32 %v1069_v17, %v263_v13  ;;  %v989_v20 = vpop.f32.mrb[1].mxu0  ;;  %v1071_v21 = vpop.f32.mrb[1].mxu1 }
 0x1c7   :  { %v1650_v22 = vadd.f32 %v989_v20, %v259_v14  ;;  %v1652_v23 = vadd.f32 %v1071_v21, %v267_v15  ;;  %v991_v24 = vpop.f32.mrb[2].mxu0  ;;  %v1073_v26 = vpop.f32.mrb[2].mxu1 }
 0x1c8   :  { %v1076_v27 = vmax.f32 %v1649_v18, 0.0  ;;  %v1078_v28 = vmax.f32 %v1651_v19, 0.0  ;;  %v992_v29 = vpop.f32.mrb[3].mxu0  ;;  %v1074_v6 = vpop.f32.mrb[3].mxu1 }
 0x1c9   :  { %v1077_v30 = vmax.f32 %v1650_v22, 0.0  ;;  %v1079_v8 = vmax.f32 %v1652_v23, 0.0 }
 0x1ca   :  { %v1080_v32 = vpack.c.bf16 %v1076_v27, %v1076_v27  ;;  %v1082_v9 = vpack.c.bf16 %v1078_v28, %v1078_v28 }
 0x1cb   :  { %v1081_v31 = vpack.c.bf16 %v1077_v30, %v1077_v30  ;;  %v1083_v7 = vpack.c.bf16 %v1079_v8, %v1079_v8 }
 0x1cd   :  { %1379 = vmatprep.mubr.bf16.mxu0 %v1081_v31  ;;  %1419 = vmatprep.mubr.bf16.mxu1 %v1083_v7 }
 0x1ce   :  { %1380 = vmatmul.mubr.bf16.vlgmr.msra.gmra.mrb[4].mxu0 %v1080_v32  ;;  %1420 = vmatmul.mubr.bf16.vlgmr.msra.gmra.mrb[4].mxu1 %v1082_v9 }
 0x2a1   :  { %v1621_v33 = vpop.f32.mrb[4].mxu0  ;;  %v1643_v34 = vpop.f32.mrb[4].mxu1 }
 0x2a2   :  { %v1622_v36 = vpop.f32.mrb[5].mxu0  ;;  %v1644_v37 = vpop.f32.mrb[5].mxu1 }
 0x2a3   :  { %v1623_v38 = vadd.f32 %v1622_v36, %v1621_v33  ;;  %v1645_v39 = vadd.f32 %v1644_v37, %v1643_v34  ;;  %v1624_v40 = vpop.f32.mrb[6].mxu0  ;;  %v1646_v41 = vpop.f32.mrb[6].mxu1 }
 0x2a4   :  { %v1625_v42 = vpop.f32.mrb[7].mxu0  ;;  %v1647_v43 = vpop.f32.mrb[7].mxu1 }
 0x2a5   :  { %v1382_v44 = vadd.f32 %v1623_v38, %v1572_v35 }
 0x2a7   :  { %v1422_v45 = vadd.f32 %v1645_v39, %v1382_v44 }
 0x2a9   :  { %1427 = vst [vmem:[#allocation7] sm:$0xff] %v1422_v45 }
 0x2aa   :  { %1949 = shalt.err (!%p1946_p6)
}
 0x2ab   :  { %s1950_s14 = scalar_lea.hbm %s2095_s7, 128 }
 0x2ac   :  { %p1951_p7 = scmp.ne.s32.totalorder %s2095_s7, %s1950_s14  ;;  %p1954_p8 = scmp.lt.u32.totalorder %s1950_s14, %s2095_s7 }
 0x2ae   :  { %p1956_p9 = pnand %p1954_p8, %p1951_p7 }
 0x2b0   :  { %1959 = shalt.err (!%p1956_p9)
}
 0x2b1   :  { %1437 = dma.vmem_to_hbm [thread:$0]  %s1435_s11, 128, %s2095_s7, [#allocation4]  }
 0x2b2   :  { %1964 = dma.done.wait [#allocation4], 128  }
 0x2b3   :  { %1965 = vsyncadd [#allocation4], 4294967168 }
 0x2b4   :  { %1441 = vsyncpa [#allocation3], 1 }
 0x2b5   :  { %1442 = vsyncpa [#allocation6], 1 }
 0x2b6   :  { %1443 = vsyncpa [#allocation4], 1 }

</bundles_post_ra>
